<compile_context>
chip_gen: v7x
topology: tpu7x:2x2x1
jax: 0.10.0
libtpu: 0.0.40
codegen_flags: <defaults>
</compile_context>

<pallas_src>
import math
from functools import partial

import jax
import jax.numpy as jnp
from jax.experimental import pallas as pl
from jax.experimental.pallas import tpu as pltpu


# --------------------------------------------------------------------------
# Tiling helpers
# --------------------------------------------------------------------------

def _pick_tile(dim, target, align):
    """Largest multiple of `align` that divides `dim` and is <= target.

    Falls back to the full dimension, which is always legal (a block dim equal
    to the array dim satisfies the (8,128) constraint)."""
    if dim <= target:
        return dim
    t = (target // align) * align
    while t >= align:
        if dim % t == 0:
            return t
        t -= align
    return dim


# > default scoped VMEM (16/32 MiB) but safely below v7x's 64 MiB physical.
_VMEM_LIMIT = 48 * 1024 * 1024


# --------------------------------------------------------------------------
# Fused tiled linear kernels: y = act(x @ w + b) (+ residual)
# --------------------------------------------------------------------------

def _matmul_accumulate(x_ref, w_ref, acc_ref):
    @pl.when(pl.program_id(2) == 0)
    def _():
        acc_ref[...] = jnp.zeros_like(acc_ref)

    acc_ref[...] += jnp.dot(x_ref[...], w_ref[...],
                            preferred_element_type=jnp.float32)


def _matmul_epilogue(acc_ref, b_ref, o_ref, activation, r_ref=None):
    @pl.when(pl.program_id(2) == pl.num_programs(2) - 1)
    def _():
        y = acc_ref[...] + b_ref[...].astype(jnp.float32)
        if activation == "gelu":
            # tanh-approximate GELU (matches BERT-pytorch's GELU module)
            y = jax.nn.gelu(y)
        if r_ref is not None:
            y = y + r_ref[...].astype(jnp.float32)   # fused residual add
        o_ref[...] = y.astype(o_ref.dtype)


def _linear_kernel(x_ref, w_ref, b_ref, o_ref, acc_ref, *, activation):
    _matmul_accumulate(x_ref, w_ref, acc_ref)
    _matmul_epilogue(acc_ref, b_ref, o_ref, activation)


def _linear_residual_kernel(x_ref, w_ref, b_ref, r_ref, o_ref, acc_ref, *,
                            activation):
    _matmul_accumulate(x_ref, w_ref, acc_ref)
    _matmul_epilogue(acc_ref, b_ref, o_ref, activation, r_ref=r_ref)


def fused_linear(x, w, b, *, activation=None, residual=None,
                 out_dtype=jnp.bfloat16,
                 tm_target=256, tn_target=256, tk_target=512):
    """x: [M, K] bf16 @ w: [K, N] bf16 + b: [N] f32 -> [M, N] bf16.

    Optionally fuses GELU and/or a residual add into the epilogue so the
    intermediate never round-trips through HBM.
    """
    M, K = x.shape
    N = w.shape[1]
    tm = _pick_tile(M, tm_target, 8)
    tn = _pick_tile(N, tn_target, 128)
    tk = _pick_tile(K, tk_target, 128)
    grid = (M // tm, N // tn, K // tk)

    in_specs = [
        pl.BlockSpec((tm, tk), lambda i, j, k: (i, k)),
        pl.BlockSpec((tk, tn), lambda i, j, k: (k, j)),
        pl.BlockSpec((1, tn), lambda i, j, k: (0, j)),
    ]
    args = [x, w, b.reshape(1, N)]
    if residual is not None:
        in_specs.append(pl.BlockSpec((tm, tn), lambda i, j, k: (i, j)))
        args.append(residual)
        kern = partial(_linear_residual_kernel, activation=activation)
    else:
        kern = partial(_linear_kernel, activation=activation)

    return pl.pallas_call(
        kern,
        out_shape=jax.ShapeDtypeStruct((M, N), out_dtype),
        grid=grid,
        in_specs=in_specs,
        out_specs=pl.BlockSpec((tm, tn), lambda i, j, k: (i, j)),
        scratch_shapes=[pltpu.VMEM((tm, tn), jnp.float32)],
        compiler_params=pltpu.CompilerParams(
            dimension_semantics=("parallel", "parallel", "arbitrary"),
            vmem_limit_bytes=_VMEM_LIMIT,
        ),
    )(*args)


# --------------------------------------------------------------------------
# Row-tiled LayerNorm
# --------------------------------------------------------------------------

def _layernorm_kernel(x_ref, g_ref, b_ref, o_ref, *, eps):
    x = x_ref[...].astype(jnp.float32)          # f32 elementwise math (v5e-safe)
    mu = jnp.mean(x, axis=-1, keepdims=True)
    var = jnp.mean(jnp.square(x - mu), axis=-1, keepdims=True)
    y = (x - mu) * jax.lax.rsqrt(var + eps)
    o_ref[...] = (y * g_ref[...].astype(jnp.float32)
                  + b_ref[...].astype(jnp.float32)).astype(o_ref.dtype)


def pallas_layernorm(x, gamma, beta, *, eps=1e-6, out_dtype=jnp.bfloat16):
    M, H = x.shape
    tm = _pick_tile(M, 512, 8)
    return pl.pallas_call(
        partial(_layernorm_kernel, eps=eps),
        out_shape=jax.ShapeDtypeStruct((M, H), out_dtype),
        grid=(M // tm,),
        in_specs=[
            pl.BlockSpec((tm, H), lambda i: (i, 0)),
            pl.BlockSpec((1, H), lambda i: (0, 0)),
            pl.BlockSpec((1, H), lambda i: (0, 0)),
        ],
        out_specs=pl.BlockSpec((tm, H), lambda i: (i, 0)),
        compiler_params=pltpu.CompilerParams(
            dimension_semantics=("parallel",),
            vmem_limit_bytes=_VMEM_LIMIT,
        ),
    )(x, gamma.reshape(1, H), beta.reshape(1, H))


# --------------------------------------------------------------------------
# Multi-head attention: all heads of one batch per grid step, lane-dense output
# --------------------------------------------------------------------------

def _attention_kernel(q_ref, k_ref, v_ref, bias_ref, o_ref, *, heads, scale):
    _, S, Hh = q_ref.shape
    dh = Hh // heads
    q = q_ref[0]           # (S, Hh) bf16, heads packed along the lane axis
    k = k_ref[0]
    v = v_ref[0]
    bias = bias_ref[0]     # (S, S) f32 additive mask (0 = attend, -1e9 = pad)
    outs = []
    for h in range(heads):                       # static unroll over heads
        qh = q[:, h * dh:(h + 1) * dh]
        kh = k[:, h * dh:(h + 1) * dh]
        vh = v[:, h * dh:(h + 1) * dh]
        # q @ k^T via explicit contraction dims (no transposed copy of k)
        s = jax.lax.dot_general(qh, kh, (((1,), (1,)), ((), ())),
                                preferred_element_type=jnp.float32) * scale
        s = s + bias
        s = s - jnp.max(s, axis=-1, keepdims=True)     # stable softmax
        p = jnp.exp(s)
        inv = pl.reciprocal(jnp.sum(p, axis=-1, keepdims=True), approx=True)
        oh = jnp.dot(p.astype(vh.dtype), vh,
                     preferred_element_type=jnp.float32) * inv
        outs.append(oh)
    # single lane-dense (S, heads*dh) store instead of per-head narrow stores
    o_ref[0] = jnp.concatenate(outs, axis=-1).astype(o_ref.dtype)
    # TODO(synk): for long sequences, tile the key axis with an online-softmax
    # (flash-style) accumulator instead of forming the full SxS score matrix.


def pallas_attention(q, k, v, attn_bias, heads, *, out_dtype=jnp.bfloat16):
    """q, k, v: [B, S, hidden] bf16 (heads packed along feature, no transposes);
    attn_bias: [B, S, S] f32 additive mask."""
    B, S, Hh = q.shape
    scale = 1.0 / math.sqrt(Hh // heads)
    return pl.pallas_call(
        partial(_attention_kernel, heads=heads, scale=scale),
        out_shape=jax.ShapeDtypeStruct((B, S, Hh), out_dtype),
        grid=(B,),
        in_specs=[
            pl.BlockSpec((1, S, Hh), lambda b: (b, 0, 0)),
            pl.BlockSpec((1, S, Hh), lambda b: (b, 0, 0)),
            pl.BlockSpec((1, S, Hh), lambda b: (b, 0, 0)),
            pl.BlockSpec((1, S, S), lambda b: (b, 0, 0)),
        ],
        out_specs=pl.BlockSpec((1, S, Hh), lambda b: (b, 0, 0)),
        compiler_params=pltpu.CompilerParams(
            dimension_semantics=("parallel",),
            vmem_limit_bytes=_VMEM_LIMIT,
        ),
    )(q, k, v, attn_bias)


# --------------------------------------------------------------------------
# Model: parameters + forward (glue in plain JAX)
# --------------------------------------------------------------------------

def sinusoidal_pos(seq_len, d_model):
    pos = jnp.arange(seq_len, dtype=jnp.float32)[:, None]
    i = jnp.arange(0, d_model, 2, dtype=jnp.float32)
    div = jnp.exp(-math.log(10000.0) * i / d_model)
    pe = jnp.zeros((seq_len, d_model), jnp.float32)
    pe = pe.at[:, 0::2].set(jnp.sin(pos * div))
    pe = pe.at[:, 1::2].set(jnp.cos(pos * div))
    return pe


def init_params(key, angle_num, hidden, n_layers, attn_heads):
    def dense(k, fan_in, fan_out):
        # weights stored bf16 (MXU input dtype); accumulation remains f32
        w = 0.02 * jax.random.normal(k, (fan_in, fan_out), jnp.float32)
        return w.astype(jnp.bfloat16)

    keys = jax.random.split(key, 1 + n_layers)
    params = {
        "hidden": hidden,
        "heads": attn_heads,
        "emb_w": dense(keys[0], angle_num, hidden),
        "emb_b": jnp.zeros((hidden,), jnp.float32),
        "layers": [],
    }
    for li in range(n_layers):
        lk = jax.random.split(keys[1 + li], 6)
        params["layers"].append(dict(
            ln1_g=jnp.ones((hidden,), jnp.float32),
            ln1_b=jnp.zeros((hidden,), jnp.float32),
            wq=dense(lk[0], hidden, hidden), bq=jnp.zeros((hidden,), jnp.float32),
            wk=dense(lk[1], hidden, hidden), bk=jnp.zeros((hidden,), jnp.float32),
            wv=dense(lk[2], hidden, hidden), bv=jnp.zeros((hidden,), jnp.float32),
            wo=dense(lk[3], hidden, hidden), bo=jnp.zeros((hidden,), jnp.float32),
            ln2_g=jnp.ones((hidden,), jnp.float32),
            ln2_b=jnp.zeros((hidden,), jnp.float32),
            w1=dense(lk[4], hidden, 4 * hidden),
            b1=jnp.zeros((4 * hidden,), jnp.float32),
            w2=dense(lk[5], 4 * hidden, hidden),
            b2=jnp.zeros((hidden,), jnp.float32),
        ))
    return params


def transformer_block(x2, attn_bias, p, heads, B, S):
    """x2: [B*S, H] bf16 -> [B*S, H] bf16 (pre-LN block, dropout = identity)."""
    H = x2.shape[1]

    # ---- multi-head self-attention sublayer ----
    hn = pallas_layernorm(x2, p["ln1_g"], p["ln1_b"])
    q = fused_linear(hn, p["wq"], p["bq"])
    k = fused_linear(hn, p["wk"], p["bk"])
    v = fused_linear(hn, p["wv"], p["bv"])
    a = pallas_attention(q.reshape(B, S, H), k.reshape(B, S, H),
                         v.reshape(B, S, H), attn_bias, heads)
    # output projection with the residual add fused into the matmul epilogue
    x2 = fused_linear(a.reshape(B * S, H), p["wo"], p["bo"], residual=x2)

    # ---- feed-forward sublayer (GELU fused into FFN-up, residual into FFN-down) ----
    hn = pallas_layernorm(x2, p["ln2_g"], p["ln2_b"])
    f = fused_linear(hn, p["w1"], p["b1"], activation="gelu")
    # TODO(synk): for large models, fuse w1+GELU+w2 into a single kernel so the
    # [M, 4H] intermediate stays in VMEM instead of a (bf16) HBM round trip.
    x2 = fused_linear(f, p["w2"], p["b2"], residual=x2)
    return x2


def bert_forward(params, x, mask):
    """x: [B, S, angle_num] f32, mask: [B, S, S] (1 = attend, 0 = pad)."""
    B, S, A = x.shape
    H = params["hidden"]
    heads = params["heads"]

    # BERTEmbedding: Linear(angle_num -> hidden) + sinusoidal positional encoding
    h = fused_linear(x.reshape(B * S, A).astype(jnp.bfloat16),
                     params["emb_w"], params["emb_b"])
    h = h.reshape(B, S, H) + sinusoidal_pos(S, H)[None].astype(jnp.bfloat16)
    h = h.reshape(B * S, H)

    # masked_fill(mask == 0, -1e9) as a precomputed additive bias, shared by all layers
    attn_bias = jnp.where(mask > 0, 0.0, -1e9).astype(jnp.float32)

    for layer in params["layers"]:
        h = transformer_block(h, attn_bias, layer, heads, B, S)
    return h.reshape(B, S, H).astype(jnp.float32)


# --------------------------------------------------------------------------
# Driver
# --------------------------------------------------------------------------

if __name__ == "__main__":
    B, S, ANGLE_NUM = 2, 8, 6
    HIDDEN, HEADS, N_LAYERS = 32, 4, 2

    key = jax.random.PRNGKey(0)
    kx, kp = jax.random.split(key)

    x = jax.random.normal(kx, (B, S, ANGLE_NUM), jnp.float32)

    # padding mask: sample 0 attends to all 8 positions, sample 1 to first 5
    lengths = jnp.array([8, 5], jnp.int32)
    key_valid = (jnp.arange(S)[None, :] < lengths[:, None]).astype(jnp.float32)
    mask = jnp.broadcast_to(key_valid[:, None, :], (B, S, S))   # [B, S, S]

    params = init_params(kp, ANGLE_NUM, HIDDEN, N_LAYERS, HEADS)

    out = bert_forward(params, x, mask)
    out = jax.block_until_ready(out)
    assert out.shape == (B, S, HIDDEN) and out.dtype == jnp.float32
    assert bool(jnp.all(jnp.isfinite(out)))
    print("KERNEL_OK")
</pallas_src>

<mosaic_0001>
module attributes {stable_mosaic.version = 11 : i64} {
  func.func @_linear_kernel(%arg0: i32, %arg1: i32, %arg2: i32, %arg3: memref<16x6xbf16, #tpu.memory_space<vmem>>, %arg4: memref<6x32xbf16, #tpu.memory_space<vmem>>, %arg5: memref<1x32xf32, #tpu.memory_space<vmem>>, %arg6: memref<16x32xbf16, #tpu.memory_space<vmem>>, %arg7: memref<16x32xf32, #tpu.memory_space<vmem>>) attributes {dimension_semantics = [#tpu.dimension_semantics<parallel>, #tpu.dimension_semantics<parallel>, #tpu.dimension_semantics<arbitrary>], iteration_bounds = array<i64: 1, 1, 1>, scalar_prefetch = 0 : i64, scratch_operands = 1 : i64, tpu.core_type = #tpu.core_type<tc>, window_params = [{transform_indices = @transform_0, window_bounds = array<i64: 16, 6>}, {transform_indices = @transform_1, window_bounds = array<i64: 6, 32>}, {transform_indices = @transform_2, window_bounds = array<i64: 1, 32>}, {transform_indices = @transform_3, window_bounds = array<i64: 16, 32>}]} {
    %c0_i32 = arith.constant 0 : i32
    %0 = arith.cmpi eq, %arg2, %c0_i32 : i32
    %1 = arith.extui %0 : i1 to i32
    %c0_i32_0 = arith.constant 0 : i32
    %2 = arith.cmpi ne, %1, %c0_i32_0 : i32
    scf.if %2 {
      %cst_10 = arith.constant 0.000000e+00 : f32
      %12 = vector.broadcast %cst_10 : f32 to vector<16x32xf32>
      %c0_11 = arith.constant 0 : index
      %c0_12 = arith.constant 0 : index
      %13 = vector.load %arg7[%c0_11, %c0_12] : memref<16x32xf32, #tpu.memory_space<vmem>>, vector<16x32xf32>
      tpu.vector_store %arg7[%c0_11, %c0_12], %12 {strides = array<i32>} : memref<16x32xf32, #tpu.memory_space<vmem>>, vector<16x32xf32>,
    } else {
    }
    %c0 = arith.constant 0 : index
    %c0_1 = arith.constant 0 : index
    %3 = vector.load %arg7[%c0, %c0_1] : memref<16x32xf32, #tpu.memory_space<vmem>>, vector<16x32xf32>
    %c0_2 = arith.constant 0 : index
    %c0_3 = arith.constant 0 : index
    %4 = vector.load %arg3[%c0_2, %c0_3] : memref<16x6xbf16, #tpu.memory_space<vmem>>, vector<16x6xbf16>
    %c0_4 = arith.constant 0 : index
    %c0_5 = arith.constant 0 : index
    %5 = vector.load %arg4[%c0_4, %c0_5] : memref<6x32xbf16, #tpu.memory_space<vmem>>, vector<6x32xbf16>
    %cst = arith.constant dense<0.000000e+00> : vector<16x32xf32>
    %6 = tpu.matmul %4, %5, %cst {dimension_numbers = #tpu.dot_dimension_numbers<[1], [0], [0], [1], [0, 0, 1, 1], [], []>} : vector<16x6xbf16>, vector<6x32xbf16>, vector<16x32xf32> -> vector<16x32xf32>
    %7 = arith.addf %3, %6 : vector<16x32xf32>
    %c0_6 = arith.constant 0 : index
    %c0_7 = arith.constant 0 : index
    %8 = vector.load %arg7[%c0_6, %c0_7] : memref<16x32xf32, #tpu.memory_space<vmem>>, vector<16x32xf32>
    tpu.vector_store %arg7[%c0_6, %c0_7], %7 {strides = array<i32>} : memref<16x32xf32, #tpu.memory_space<vmem>>, vector<16x32xf32>,
    %c0_i32_8 = arith.constant 0 : i32
    %9 = arith.cmpi eq, %arg2, %c0_i32_8 : i32
    %10 = arith.extui %9 : i1 to i32
    %c0_i32_9 = arith.constant 0 : i32
    %11 = arith.cmpi ne, %10, %c0_i32_9 : i32
    scf.if %11 {
      %c0_10 = arith.constant 0 : index
      %c0_11 = arith.constant 0 : index
      %12 = vector.load %arg7[%c0_10, %c0_11] : memref<16x32xf32, #tpu.memory_space<vmem>>, vector<16x32xf32>
      %c0_12 = arith.constant 0 : index
      %c0_13 = arith.constant 0 : index
      %13 = vector.load %arg5[%c0_12, %c0_13] : memref<1x32xf32, #tpu.memory_space<vmem>>, vector<1x32xf32>
      %14 = vector.broadcast %13 : vector<1x32xf32> to vector<16x32xf32>
      %15 = arith.addf %12, %14 : vector<16x32xf32>
      %16 = arith.truncf %15 : vector<16x32xf32> to vector<16x32xbf16>
      %c0_14 = arith.constant 0 : index
      %c0_15 = arith.constant 0 : index
      %17 = vector.load %arg6[%c0_14, %c0_15] : memref<16x32xbf16, #tpu.memory_space<vmem>>, vector<16x32xbf16>
      tpu.vector_store %arg6[%c0_14, %c0_15], %16 {strides = array<i32>} : memref<16x32xbf16, #tpu.memory_space<vmem>>, vector<16x32xbf16>,
    } else {
    }
    return
  }
  func.func @transform_0(%arg0: i32, %arg1: i32, %arg2: i32) -> (i32, i32) {
    %c0_i32 = arith.constant 0 : i32
    return %arg0, %arg2 : i32, i32
  }
  func.func @transform_1(%arg0: i32, %arg1: i32, %arg2: i32) -> (i32, i32) {
    %c0_i32 = arith.constant 0 : i32
    return %arg2, %arg1 : i32, i32
  }
  func.func @transform_2(%arg0: i32, %arg1: i32, %arg2: i32) -> (i32, i32) {
    %c0_i32 = arith.constant 0 : i32
    %c0_i32_0 = arith.constant 0 : i32
    return %c0_i32, %arg1 : i32, i32
  }
  func.func @transform_3(%arg0: i32, %arg1: i32, %arg2: i32) -> (i32, i32) {
    %c0_i32 = arith.constant 0 : i32
    return %arg0, %arg1 : i32, i32
  }
}

</mosaic_0001>

<bundles_post_ra>
// kernel: tpu_custom_call.1
= control target key start
LH: loop header
LB: loop body
LE: loop exit
PB: predicated region body
PF: predicated region fallthrough
CT: control target
= control target key end

     0   :  { %vm20_vm0 = vcmask 261120   ;;  %vm37_vm1 = vcmask 1042432   ;;  %v173_v1 = vmov 0.0   ;;  %vm174_vm2 = vmmov 0   ;;  %s223_s0 = inlined_call_operand.vmem [shape: bf16[16,6], index: 0, kind: input, shape index: {}]   ;;  %s224_s1 = inlined_call_operand.vmem [shape: bf16[6,32], index: 1, kind: input, shape index: {}]   ;;  %s225_s2 = inlined_call_operand.vmem [shape: f32[1,32], index: 2, kind: input, shape index: {}]   ;;  %s226_s3 = inlined_call_operand.hbm [shape: bf16[16,32], index: 3, kind: output, shape index: {}]  }
   0x1   :  { %v27_v0 = vld [vmem:[%s224_s1] sm:$0x7]  ;;  %21 = vst.msk [vmem:[#allocation2] sm:$0xff] %vm20_vm0, %v173_v1  ;;  %22 = vst.msk [vmem:[#allocation2 + $0x8] sm:$0xff] %vm20_vm0, %v173_v1  ;;  %137 = vmatprep.subr.bf16.mxu0 %v173_v1  ;;  %139 = vmatprep.mubr.msk.bf16.mxu0 %vm174_vm2, %v173_v1  ;;  %vm33_vm3 = vcmask 48128  }
   0x2   :  { %v39_v2 = vsel %vm37_vm1, %v27_v0, 0  ;;  %v148_v3 = vld [vmem:[%s223_s0] sm:$0xff]  }
   0x3   :  { %138 = vmatpush3.bf16.msra.mxu0 %v39_v2 }
   0x4   :  { %8 = vsyncpa [#allocation4], 0  ;;  %v130_v12 = vld [vmem:[%s225_s2] ss:$0 sm:$0xff]  ;;  %s175_s0 = smov [#allocation3]   ;;  %vm109_vm4 = vcmask 257024  }
   0x5   :  { %s117_s17 = sshll.u32 %s175_s0, 4  ;;  %s118_s17 = int_to_ptr.vmem [resolvable:$true] %s117_s17 }
   0x6   :  { %140 = vmatmul.mubr.msk.bf16.vlgmr.msra.gmra.mrb[0].mxu0 %vm33_vm3, %v148_v3  ;;  %s149_s18 = scalar_lea.vmem %s118_s17, 128  ;;  %p154_p1 = scmp.lt.s32.totalorder %s118_s17, %s118_s17 }
   0x7   :  { %p150_p0 = scmp.ne.s32.totalorder %s118_s17, %s149_s18  ;;  %p155_p2 = scmp.lt.s32.totalorder %s149_s18, %s149_s18 }
   0x8   :  { %v23_v4 = vld [vmem:[#allocation2] sm:$0xff]  ;;  %v24_v6 = vld [vmem:[#allocation2 + $0x8] sm:$0xff] }
   0x9   :  { %p156_p3 = por %p155_p2, %p154_p1 }
   0xb   :  { %p157_p4 = pnand %p156_p3, %p150_p0 }
  0xd9   :  { %v75_v5 = vpop.f32.mrb[0].mxu0 }
  0xda   :  { %v82_v7 = vadd.f32 %v75_v5, %v23_v4  ;;  %v141_v8 = vpop.f32.mrb[1].mxu0 }
  0xdb   :  { %v78_v9 = vpop.f32.mrb[2].mxu0 }
  0xdc   :  { %85 = vst.msk [vmem:[#allocation2] sm:$0xff] %vm20_vm0, %v82_v7  ;;  %v83_v10 = vadd.f32 %v78_v9, %v24_v6  ;;  %v142_v11 = vpop.f32.mrb[3].mxu0 }
  0xde   :  { %86 = vst.msk [vmem:[#allocation2 + $0x8] sm:$0xff] %vm20_vm0, %v83_v10 }
  0xe3   :  { %v90_v13 = vld [vmem:[#allocation2] sm:$0xff] }
  0xe4   :  { %v99_v14 = vadd.f32 %v130_v12, %v90_v13 }
  0xe5   :  { %v91_v15 = vld [vmem:[#allocation2 + $0x8] sm:$0xff] }
  0xe6   :  { %v100_v16 = vadd.f32 %v130_v12, %v91_v15  ;;  %v133_v17 = vpack.c.bf16 %v99_v14, %v99_v14 }
  0xe8   :  { %v134_v18 = vpack.c.bf16 %v100_v16, %v100_v16  ;;  %110 = vst.msk [vmem:[#allocation3] sm:$0xf] %vm109_vm4, %v133_v17 }
  0xea   :  { %111 = vst.msk [vmem:[#allocation3 + $0x4] sm:$0xf] %vm109_vm4, %v134_v18 }
  0xeb   :  { %160 = shalt.err (!%p157_p4)
}
  0xec   :  { %s161_s20 = scalar_lea.hbm %s226_s3, 128 }
  0xed   :  { %p162_p5 = scmp.ne.s32.totalorder %s226_s3, %s161_s20  ;;  %p165_p6 = scmp.lt.u32.totalorder %s161_s20, %s226_s3 }
  0xef   :  { %p167_p7 = pnand %p165_p6, %p162_p5 }
  0xf1   :  { %170 = shalt.err (!%p167_p7)
}
  0xf2   :  { %s176_s25 = smov 64   ;;  %s177_s26 = smov 4  }
  0xf3   :  { %123 = dma.vmem_to_hbm [thread:$0]  %s118_s17, 128, %s226_s3, [#allocation4], %s176_s25, %s176_s25, %s177_s26  }
  0xf4   :  { %171 = dma.done.wait [#allocation4], 128  }
  0xf5   :  { %172 = vsyncadd [#allocation4], 4294967168 }
  0xf6   :  { %127 = vsyncpa [#allocation4], 1 }

</bundles_post_ra>
